<compile_context>
chip_gen: v6e
topology: v6e:2x2x1
jax: 0.10.0
libtpu: 0.0.40
codegen_flags: <defaults>
</compile_context>

<pallas_src>
import functools

import jax
import jax.numpy as jnp
from jax.experimental import pallas as pl
from jax.experimental.pallas import tpu as pltpu

MARGIN = 0.2
EPS = 1e-6          # PyTorch PairwiseDistance default eps (added to the difference)
_OUT_LANES = 128    # lane-dense per-tile partial-sum output row


def _triplet_loss_kernel(a_ref, p_ref, n_ref, psum_ref, *,
                         batch, tile_b, margin, need_mask):
    pid = pl.program_id(0)

    a = a_ref[...]
    p = p_ref[...]
    n = n_ref[...]

    # Differences in the native dtype (bf16 VALU on v6e/v7x); single upcast to
    # f32, then EPS, square, lane-axis reduce.
    dp = (a - p).astype(jnp.float32) + EPS
    dn = (a - n).astype(jnp.float32) + EPS
    dp_sq = jnp.sum(dp * dp, axis=-1, keepdims=True)   # (tile_b, 1)
    dn_sq = jnp.sum(dn * dn, axis=-1, keepdims=True)   # (tile_b, 1)
    hinge = jnp.maximum(jnp.sqrt(dp_sq) - jnp.sqrt(dn_sq) + margin, 0.0)

    def _write(partial):
        # Broadcast the per-tile partial across the 128-lane output row so the
        # store is unmasked / lane-dense; the wrapper reads column 0.
        psum_ref[...] = jnp.broadcast_to(partial, (1, _OUT_LANES))

    if need_mask:
        last = pl.num_programs(0) - 1

        @pl.when(pid != last)
        def _plain():
            _write(jnp.sum(hinge))

        @pl.when(pid == last)
        def _masked():
            # Padded rows of the ragged last tile hold stale VMEM data and may
            # be NaN/Inf; select (not multiply) zeros for them.
            row = jax.lax.broadcasted_iota(jnp.int32, hinge.shape, 0) + pid * tile_b
            _write(jnp.sum(jnp.where(row < batch, hinge, 0.0)))
    else:
        _write(jnp.sum(hinge))


def _tpu_vmem_bytes():
    try:
        return int(pltpu.get_tpu_info().vmem_capacity_bytes)
    except Exception:
        return 64 << 20   # conservative default (v7x-sized VMEM)


def triplet_loss(a, p, n, *, margin=MARGIN, tile_rows=None):
    assert a.shape == p.shape == n.shape and a.ndim == 2
    B, D = a.shape
    itemsize = jnp.dtype(a.dtype).itemsize
    assert itemsize in (2, 4), "only 2- and 4-byte input dtypes are supported"
    row_mult = 16 if itemsize == 2 else 8          # sublane packing (bf16 vs f32)

    vmem_cap = _tpu_vmem_bytes()
    if tile_rows is None:
        # 3 inputs x 2 pipeline buffers resident; keep them under ~half VMEM.
        # ~5 MiB per input on v7x (64 MiB VMEM), ~10 MiB on v5e/v6e (128 MiB).
        target_tile_bytes = max(1 << 20, min(12 << 20, (vmem_cap // 2) // 6))
        tb = (target_tile_bytes // (D * itemsize)) // row_mult * row_mult
        tb = max(row_mult, tb)
    else:
        tb = max(row_mult, (tile_rows + row_mult - 1) // row_mult * row_mult)
    padded_b = (B + row_mult - 1) // row_mult * row_mult
    tb = min(tb, padded_b)

    num_tiles = (B + tb - 1) // tb
    tile_bytes = tb * D * itemsize
    # 3 inputs x 2 pipeline buffers + output/headroom, capped at physical VMEM.
    vmem_limit = int(min(vmem_cap, 6 * tile_bytes + (8 << 20)))
    vmem_limit = max(vmem_limit, 16 << 20)

    kernel = functools.partial(
        _triplet_loss_kernel,
        batch=B, tile_b=tb, margin=margin, need_mask=(B % tb != 0),
    )

    partials = pl.pallas_call(
        kernel,
        out_shape=jax.ShapeDtypeStruct((num_tiles, _OUT_LANES), jnp.float32),
        grid=(num_tiles,),
        in_specs=[
            pl.BlockSpec((tb, D), lambda i: (i, 0)),
            pl.BlockSpec((tb, D), lambda i: (i, 0)),
            pl.BlockSpec((tb, D), lambda i: (i, 0)),
        ],
        out_specs=pl.BlockSpec((1, _OUT_LANES), lambda i: (i, 0)),
        compiler_params=pltpu.CompilerParams(
            dimension_semantics=("parallel",),   # independent per-tile partials
            vmem_limit_bytes=vmem_limit,
        ),
        cost_estimate=pl.CostEstimate(
            flops=8 * B * D + 6 * B,
            transcendentals=2 * B,
            bytes_accessed=3 * B * D * itemsize + num_tiles * _OUT_LANES * 4,
        ),
    )(a, p, n)

    # Final reduce + mean over the true batch size: trivial XLA ops.
    return jnp.sum(partials[:, 0]) * (1.0 / B)


def _ref_loss(a, p, n, margin=MARGIN):
    # Matches the kernel semantics (diff in native dtype, EPS/sqrt in f32);
    # identical to PyTorch's PairwiseDistance path for f32 inputs.
    dp = (a - p).astype(jnp.float32) + EPS
    dn = (a - n).astype(jnp.float32) + EPS
    d_p = jnp.sqrt(jnp.sum(dp * dp, axis=-1))
    d_n = jnp.sqrt(jnp.sum(dn * dn, axis=-1))
    return jnp.mean(jnp.maximum(d_p - d_n + margin, 0.0))


if __name__ == "__main__":
    key = jax.random.PRNGKey(0)

    # Case 1: small f32 embedding batch (matches the module's toy usage).
    B, D = 8, 128
    ka, kp, kn = jax.random.split(key, 3)
    a = jax.random.normal(ka, (B, D), dtype=jnp.float32)
    p = jax.random.normal(kp, (B, D), dtype=jnp.float32)
    n = jax.random.normal(kn, (B, D), dtype=jnp.float32)

    loss = triplet_loss(a, p, n)
    jax.block_until_ready(loss)
    ref = _ref_loss(a, p, n)
    assert jnp.allclose(loss, ref, atol=1e-5, rtol=1e-4), (loss, ref)

    # Case 2: multi-tile parallel grid with a ragged last tile (exercises the
    # per-tile partial sums and the last-tile-only masking branch).
    B2, D2, TILE2 = 40, 128, 16
    kb = jax.random.split(key, 9)
    a2 = jax.random.normal(kb[3], (B2, D2), dtype=jnp.float32)
    p2 = jax.random.normal(kb[4], (B2, D2), dtype=jnp.float32)
    n2 = jax.random.normal(kb[5], (B2, D2), dtype=jnp.float32)

    loss2 = triplet_loss(a2, p2, n2, tile_rows=TILE2)
    jax.block_until_ready(loss2)
    ref2 = _ref_loss(a2, p2, n2)
    assert jnp.allclose(loss2, ref2, atol=1e-5, rtol=1e-4), (loss2, ref2)

    # Case 3: bf16 inputs, even multi-tile split (native-dtype diff path).
    B3, D3, TILE3 = 64, 256, 32
    a3 = jax.random.normal(kb[6], (B3, D3), dtype=jnp.bfloat16)
    p3 = jax.random.normal(kb[7], (B3, D3), dtype=jnp.bfloat16)
    n3 = jax.random.normal(kb[8], (B3, D3), dtype=jnp.bfloat16)

    loss3 = triplet_loss(a3, p3, n3, tile_rows=TILE3)
    jax.block_until_ready(loss3)
    ref3 = _ref_loss(a3, p3, n3)
    assert jnp.allclose(loss3, ref3, atol=1e-4, rtol=1e-3), (loss3, ref3)

    print("KERNEL_OK")
</pallas_src>

<mosaic_0001>
module attributes {stable_mosaic.version = 11 : i64} {
  func.func @_triplet_loss_kernel(%arg0: i32, %arg1: memref<8x128xf32, #tpu.memory_space<vmem>>, %arg2: memref<8x128xf32, #tpu.memory_space<vmem>>, %arg3: memref<8x128xf32, #tpu.memory_space<vmem>>, %arg4: memref<1x128xf32, #tpu.memory_space<vmem>>) attributes {dimension_semantics = [#tpu.dimension_semantics<parallel>], iteration_bounds = array<i64: 1>, scalar_prefetch = 0 : i64, scratch_operands = 0 : i64, tpu.core_type = #tpu.core_type<tc>, window_params = [{transform_indices = @transform_0, window_bounds = array<i64: 8, 128>}, {transform_indices = @transform_1, window_bounds = array<i64: 8, 128>}, {transform_indices = @transform_2, window_bounds = array<i64: 8, 128>}, {transform_indices = @transform_3, window_bounds = array<i64: 1, 128>}]} {
    %c0 = arith.constant 0 : index
    %c0_0 = arith.constant 0 : index
    %0 = vector.load %arg1[%c0, %c0_0] : memref<8x128xf32, #tpu.memory_space<vmem>>, vector<8x128xf32>
    %c0_1 = arith.constant 0 : index
    %c0_2 = arith.constant 0 : index
    %1 = vector.load %arg2[%c0_1, %c0_2] : memref<8x128xf32, #tpu.memory_space<vmem>>, vector<8x128xf32>
    %c0_3 = arith.constant 0 : index
    %c0_4 = arith.constant 0 : index
    %2 = vector.load %arg3[%c0_3, %c0_4] : memref<8x128xf32, #tpu.memory_space<vmem>>, vector<8x128xf32>
    %3 = arith.subf %0, %1 : vector<8x128xf32>
    %cst = arith.constant 9.99999997E-7 : f32
    %4 = vector.broadcast %cst : f32 to vector<8x128xf32>
    %5 = arith.addf %3, %4 : vector<8x128xf32>
    %6 = arith.subf %0, %2 : vector<8x128xf32>
    %cst_5 = arith.constant 9.99999997E-7 : f32
    %7 = vector.broadcast %cst_5 : f32 to vector<8x128xf32>
    %8 = arith.addf %6, %7 : vector<8x128xf32>
    %9 = arith.mulf %5, %5 : vector<8x128xf32>
    %cst_6 = arith.constant dense<0.000000e+00> : vector<8xf32>
    %10 = vector.multi_reduction <add>, %9, %cst_6 [1] : vector<8x128xf32> to vector<8xf32>
    %11 = vector.shape_cast %10 : vector<8xf32> to vector<8x1xf32>
    %12 = arith.mulf %8, %8 : vector<8x128xf32>
    %cst_7 = arith.constant dense<0.000000e+00> : vector<8xf32>
    %13 = vector.multi_reduction <add>, %12, %cst_7 [1] : vector<8x128xf32> to vector<8xf32>
    %14 = vector.shape_cast %13 : vector<8xf32> to vector<8x1xf32>
    %15 = math.sqrt %11 : vector<8x1xf32>
    %16 = math.sqrt %14 : vector<8x1xf32>
    %17 = arith.subf %15, %16 : vector<8x1xf32>
    %cst_8 = arith.constant 2.000000e-01 : f32
    %18 = vector.broadcast %cst_8 : f32 to vector<8x1xf32>
    %19 = arith.addf %17, %18 : vector<8x1xf32>
    %cst_9 = arith.constant 0.000000e+00 : f32
    %20 = vector.broadcast %cst_9 : f32 to vector<8x1xf32>
    %21 = arith.maximumf %19, %20 : vector<8x1xf32>
    %22 = vector.shape_cast %21 : vector<8x1xf32> to vector<1x8x1xf32>
    %cst_10 = arith.constant dense<0.000000e+00> : vector<1xf32>
    %23 = vector.multi_reduction <add>, %22, %cst_10 [1, 2] : vector<1x8x1xf32> to vector<1xf32>
    %24 = vector.shape_cast %23 : vector<1xf32> to vector<1x1x1xf32>
    %25 = vector.extract %24[0, 0, 0] : f32 from vector<1x1x1xf32>
    %26 = vector.broadcast %25 : f32 to vector<1x128xf32>
    %c0_11 = arith.constant 0 : index
    %c0_12 = arith.constant 0 : index
    %27 = vector.load %arg4[%c0_11, %c0_12] : memref<1x128xf32, #tpu.memory_space<vmem>>, vector<1x128xf32>
    tpu.vector_store %arg4[%c0_11, %c0_12], %26 {strides = array<i32>} : memref<1x128xf32, #tpu.memory_space<vmem>>, vector<1x128xf32>,
    return
  }
  func.func @transform_0(%arg0: i32) -> (i32, i32) {
    %c0_i32 = arith.constant 0 : i32
    %c0_i32_0 = arith.constant 0 : i32
    return %arg0, %c0_i32 : i32, i32
  }
  func.func @transform_1(%arg0: i32) -> (i32, i32) {
    %c0_i32 = arith.constant 0 : i32
    %c0_i32_0 = arith.constant 0 : i32
    return %arg0, %c0_i32 : i32, i32
  }
  func.func @transform_2(%arg0: i32) -> (i32, i32) {
    %c0_i32 = arith.constant 0 : i32
    %c0_i32_0 = arith.constant 0 : i32
    return %arg0, %c0_i32 : i32, i32
  }
  func.func @transform_3(%arg0: i32) -> (i32, i32) {
    %c0_i32 = arith.constant 0 : i32
    %c0_i32_0 = arith.constant 0 : i32
    return %arg0, %c0_i32 : i32, i32
  }
}

</mosaic_0001>

<bundles_post_ra>
// kernel: tpu_custom_call.1
= control target key start
LH: loop header
LB: loop body
LE: loop exit
PB: predicated region body
PF: predicated region fallthrough
CT: control target
= control target key end

     0   :  { %8 = vsyncpa [#allocation3], 0  ;;  %s241_s0 = inlined_call_operand.hbm [shape: f32[8,128], index: 0, kind: input, shape index: {}]   ;;  %s242_s1 = inlined_call_operand.hbm [shape: f32[8,128], index: 1, kind: input, shape index: {}]   ;;  %s243_s2 = inlined_call_operand.hbm [shape: f32[8,128], index: 2, kind: input, shape index: {}]   ;;  %s244_s3 = inlined_call_operand.hbm [shape: f32[1,128], index: 3, kind: output, shape index: {}]  }
   0x1   :  { %9 = vsyncpa [#allocation6], 0 }
   0x2   :  { %10 = vsyncpa [#allocation4], 0  ;;  %s205_s12 = smov [#allocation5]   ;;  %s206_s14 = smov [#allocation2]  }
   0x3   :  { %s27_s13 = sshll.u32 %s205_s12, 4  ;;  %s17_s15 = sshll.u32 %s206_s14, 4  ;;  %s28_s13 = int_to_ptr.vmem [resolvable:$true] %s27_s13  ;;  %s18_s15 = int_to_ptr.vmem [resolvable:$true] %s17_s15 }
   0x4   :  { %s127_s16 = scalar_lea.vmem %s28_s13, 128  ;;  %p132_p1 = scmp.lt.s32.totalorder %s28_s13, %s28_s13 }
   0x5   :  { %p128_p0 = scmp.ne.s32.totalorder %s28_s13, %s127_s16  ;;  %p133_p2 = scmp.lt.s32.totalorder %s127_s16, %s127_s16 }
   0x7   :  { %p134_p3 = por %p133_p2, %p132_p1 }
   0x9   :  { %p135_p4 = pnand %p134_p3, %p128_p0 }
   0xb   :  { %138 = shalt.err (!%p135_p4)
}
   0xc   :  { %30 = dma.hbm_to_vmem [thread:$0]  %s242_s1, 128, %s28_s13, [#allocation6]  }
   0xd   :  { %s147_s19 = scalar_lea.vmem %s18_s15, 128  ;;  %p152_p6 = scmp.lt.s32.totalorder %s18_s15, %s18_s15 }
   0xe   :  { %p148_p5 = scmp.ne.s32.totalorder %s18_s15, %s147_s19  ;;  %p153_p7 = scmp.lt.s32.totalorder %s147_s19, %s147_s19 }
  0x10   :  { %p154_p8 = por %p153_p7, %p152_p6 }
  0x12   :  { %p155_p9 = pnand %p154_p8, %p148_p5 }
  0x14   :  { %158 = shalt.err (!%p155_p9)
}
  0x15   :  { %20 = dma.hbm_to_vmem [thread:$0]  %s241_s0, 128, %s18_s15, [#allocation3]  }
  0x16   :  { %s207_s22 = smov [#allocation7]  }
  0x17   :  { %s37_s23 = sshll.u32 %s207_s22, 4  ;;  %s38_s23 = int_to_ptr.vmem [resolvable:$true] %s37_s23 }
  0x18   :  { %s167_s24 = scalar_lea.vmem %s38_s23, 128  ;;  %p172_p11 = scmp.lt.s32.totalorder %s38_s23, %s38_s23 }
  0x19   :  { %p168_p10 = scmp.ne.s32.totalorder %s38_s23, %s167_s24  ;;  %p173_p12 = scmp.lt.s32.totalorder %s167_s24, %s167_s24 }
  0x1b   :  { %p174_p13 = por %p173_p12, %p172_p11 }
  0x1d   :  { %p175_p0 = pnand %p174_p13, %p168_p10 }
  0x1f   :  { %178 = shalt.err (!%p175_p0)
}
  0x20   :  { %40 = dma.hbm_to_vmem [thread:$0]  %s243_s2, 128, %s38_s23, [#allocation6]  }
  0x21   :  { %199 = dma.done.wait [#allocation3], 128  }
  0x22   :  { %200 = vsyncadd [#allocation3], 4294967168 }
  0x23   :  { %201 = dma.done.wait [#allocation6], 256  }
  0x24   :  { %202 = vsyncadd [#allocation6], 4294967040  ;;  %v50_v0 = vld [vmem:[#allocation2] sm:$0xff]  ;;  %v51_v1 = vld [vmem:[#allocation5] sm:$0xff]  ;;  %vm80_vm4 = vcmask 7168   ;;  %s208_s0 = smov [#allocation8]  }
  0x25   :  { %v52_v2 = vld [vmem:[#allocation7] sm:$0xff]  ;;  %v53_v3 = vsub.f32 %v50_v0, %v51_v1  ;;  %s99_s2 = sshll.u32 %s208_s0, 4  ;;  %s100_s2 = int_to_ptr.vmem [resolvable:$true] %s99_s2 }
  0x26   :  { %v55_v4 = vsub.f32 %v50_v0, %v52_v2  ;;  %s179_s27 = scalar_lea.vmem %s100_s2, 16  ;;  %s183_s28 = scalar_lea.vmem %s100_s2, 32 }
  0x27   :  { %v54_v5 = vadd.f32 1e-06, %v53_v3  ;;  %p180_p1 = scmp.ne.s32.totalorder %s100_s2, %s179_s27  ;;  %p184_p2 = scmp.lt.s32.totalorder %s100_s2, %s100_s2 }
  0x28   :  { %v56_v6 = vadd.f32 1e-06, %v55_v4  ;;  %p185_p3 = scmp.lt.s32.totalorder %s183_s28, %s179_s27 }
  0x29   :  { %v57_v7 = vmul.f32 %v54_v5, %v54_v5 }
  0x2a   :  { %v60_v8 = vmul.f32 %v56_v6, %v56_v6  ;;  %p186_p4 = por %p185_p3, %p184_p2 }
  0x2b   :  { %58 = vadd.xlane.f32.xlu0 %v57_v7 }
  0x2c   :  { %p187_p5 = pnand %p186_p4, %p180_p1 }
  0x2f   :  { %61 = vadd.xlane.f32.xlu0 %v60_v8 }
  0xb4   :  { %v59_v9 = vpop.xlane.xlu0 %58 }
  0xb5   :  { %115 = vrsqrt.f32 %v59_v9  ;;  %vm65_vm0 = vcmp.eq.f32.partialorder %v59_v9, inf  ;;  %v68_v16 = vand.u32 2147483648, %v59_v9  ;;  %vm67_vm2 = vcmp.eq.f32.partialorder %v59_v9, 0.0 }
  0xb8   :  { %v62_v10 = vpop.xlane.xlu0 %61 }
  0xb9   :  { %117 = vrsqrt.f32 %v62_v10  ;;  %vm72_vm1 = vcmp.eq.f32.partialorder %v62_v10, inf  ;;  %v75_v17 = vand.u32 2147483648, %v62_v10  ;;  %vm74_vm3 = vcmp.eq.f32.partialorder %v62_v10, 0.0 }
  0xc2   :  { %v116_v11 = vpop.eup %115 }
  0xc3   :  { %v64_v12 = vmul.f32 %v116_v11, %v59_v9 }
  0xc5   :  { %v66_v15 = vsel %vm65_vm0, %v59_v9, %v64_v12 }
  0xc6   :  { %v118_v13 = vpop.eup %117  ;;  %v69_v19 = vsel %vm67_vm2, %v68_v16, %v66_v15 }
  0xc7   :  { %v71_v14 = vmul.f32 %v118_v13, %v62_v10 }
  0xc9   :  { %v73_v18 = vsel %vm72_vm1, %v62_v10, %v71_v14 }
  0xca   :  { %v76_v20 = vsel %vm74_vm3, %v75_v17, %v73_v18 }
  0xcb   :  { %v77_v21 = vsub.f32 %v69_v19, %v76_v20 }
  0xcd   :  { %v78_v22 = vadd.f32 0.2, %v77_v21 }
  0xcf   :  { %v79_v23 = vmax.f32 %v78_v22, 0.0 }
  0xd1   :  { %v81_v24 = vsel %vm80_vm4, %v79_v23, 0.0 }
  0xd2   :  { %82 = vadd.xlane.f32.xlu1 %v81_v24 }
 0x15b   :  { %v83_v25 = vpop.xlane.xlu1 %82 }
 0x15c   :  { %v84_v26 = vrot.slane %v83_v25, 4 }
 0x15e   :  { %v85_v27 = vadd.f32 %v84_v26, %v83_v25 }
 0x160   :  { %v86_v28 = vrot.slane %v85_v27, 2 }
 0x162   :  { %v87_v29 = vadd.f32 %v86_v28, %v85_v27 }
 0x164   :  { %v88_v30 = vrot.slane %v87_v29, 1 }
 0x166   :  { %v89_v31 = vadd.f32 %v88_v30, %v87_v29 }
 0x168   :  { %109 = vpush %v89_v31 }
 0x199   :  { %s110_s26 = spop %109 }
 0x19a   :  { %v91_v32 = vstv %s110_s26 }
 0x19b   :  { %92 = vst [vmem:[#allocation8] sm:$0x1] %v91_v32 }
 0x19c   :  { %190 = shalt.err (!%p187_p5)
}
 0x19d   :  { %102 = dma.vmem_to_hbm [thread:$0]  %s100_s2, 16, %s244_s3, [#allocation4]  }
 0x19e   :  { %203 = dma.done.wait [#allocation4], 16  }
 0x19f   :  { %204 = vsyncadd [#allocation4], 4294967280 }
 0x1a0   :  { %106 = vsyncpa [#allocation3], 1 }
 0x1a1   :  { %107 = vsyncpa [#allocation6], 1 }
 0x1a2   :  { %108 = vsyncpa [#allocation4], 1 }

</bundles_post_ra>
